<compile_context>
chip_gen: v5e
topology: v5e:2x2
jax: 0.10.0
libtpu: 0.0.40
codegen_flags: <defaults>
</compile_context>

<pallas_src>
import functools

import jax
import jax.numpy as jnp
from jax import lax
from jax.experimental import pallas as pl
from jax.experimental.pallas import tpu as pltpu

_LANES = 128
_NEG_INF = float("-inf")


def _fc_epilogue(avg, mx, w1_ref, w2_ref, o_ref):
    """o_ref[(nb,1,C)] = sigmoid(fc2(relu(fc1(avg))) + fc2(relu(fc1(mx))))."""
    w1 = w1_ref[...].astype(jnp.float32)   # (C, Cr)
    w2 = w2_ref[...].astype(jnp.float32)   # (Cr, C)
    h_avg = jnp.maximum(jnp.dot(avg, w1, preferred_element_type=jnp.float32), 0.0)
    h_max = jnp.maximum(jnp.dot(mx, w1, preferred_element_type=jnp.float32), 0.0)
    o_avg = jnp.dot(h_avg, w2, preferred_element_type=jnp.float32)
    o_max = jnp.dot(h_max, w2, preferred_element_type=jnp.float32)
    att = jax.nn.sigmoid(o_avg + o_max)    # (nb, C)
    # Tiny static per-row store (avoids a (nb, C) -> (nb, 1, C) relayout).
    for r in range(o_ref.shape[0]):
        o_ref[r, 0, :] = att[r, :].astype(o_ref.dtype)


def _ca_kernel(x_ref, w1_ref, w2_ref, o_ref, sum_ref, max_ref, *,
               inv_hw, hw_total, hw_chunk, ragged, direct):
    if direct:
        # Single small, lane-unaligned spatial chunk: reduce it directly.
        # (The XLU reduce runs exactly once, so deferral gains nothing here.)
        x = x_ref[...].astype(jnp.float32)                   # (nb, C, HW)
        _fc_epilogue(jnp.sum(x, axis=-1) * inv_hw, jnp.max(x, axis=-1),
                     w1_ref, w2_ref, o_ref)
        return

    hw_step = pl.program_id(1)
    n_hw = pl.num_programs(1)
    n_slices = hw_chunk // _LANES

    @pl.when(hw_step == 0)
    def _init():
        sum_ref[...] = jnp.zeros_like(sum_ref)
        max_ref[...] = jnp.full_like(max_ref, _NEG_INF)

    def _accumulate(masked):
        # Lane-aligned partial accumulation: one load per 128-lane slice feeds
        # BOTH running sum and running max (pure VPU adds/maxes every step).
        base = hw_step * hw_chunk

        def step(start, s, m):
            sl = x_ref[:, :, pl.ds(start, _LANES)].astype(jnp.float32)
            if masked:
                lane = lax.broadcasted_iota(jnp.int32, sl.shape, 2)
                valid = (base + start + lane) < hw_total
                sl_s = jnp.where(valid, sl, 0.0)
                sl_m = jnp.where(valid, sl, _NEG_INF)
            else:
                sl_s = sl
                sl_m = sl
            return s + sl_s, jnp.maximum(m, sl_m)

        s, m = sum_ref[...], max_ref[...]
        if n_slices <= 32:
            for i in range(n_slices):                      # fully unrolled
                s, m = step(i * _LANES, s, m)
        else:
            def body(i, carry):
                start = pl.multiple_of(i * _LANES, _LANES)
                return step(start, *carry)
            s, m = lax.fori_loop(0, n_slices, body, (s, m), unroll=8)
        sum_ref[...] = s
        max_ref[...] = m

    if ragged:
        is_last = hw_step == n_hw - 1

        @pl.when(is_last)
        def _acc_masked():
            _accumulate(True)

        @pl.when(jnp.logical_not(is_last))
        def _acc_plain():
            _accumulate(False)
    else:
        _accumulate(False)

    @pl.when(hw_step == n_hw - 1)
    def _finalize():
        # Single cross-lane (XLU) reduce per batch tile, then the tiny MLP.
        avg = jnp.sum(sum_ref[...], axis=-1) * inv_hw       # (nb, C)
        mx = jnp.max(max_ref[...], axis=-1)                 # (nb, C)
        _fc_epilogue(avg, mx, w1_ref, w2_ref, o_ref)


def _pick_batch_tile(n, c):
    if n <= 1:
        return 1
    nb = min(8, max(1, n // 2))          # >= 2 batch tiles -> both v7x TensorCores
    while nb > 1 and nb * c > 128:       # keep in-loop f32 accumulators vreg-friendly
        nb //= 2
    return nb


def _pick_hw_chunk(hw, nb, c, itemsize, budget_bytes):
    """Largest lane-aligned spatial chunk whose per-step input block fits the
    VMEM budget (dtype-aware).  Never returns a block larger than the budget
    unless the entire spatial extent fits in a single block."""
    max_elems = max(_LANES, budget_bytes // (itemsize * nb * c))
    if hw <= max_elems:
        return hw                        # single spatial step (may be lane-unaligned)
    cand = (max_elems // _LANES) * _LANES
    c2 = cand
    while c2 * 2 >= cand and c2 >= _LANES:
        if hw % c2 == 0:                 # prefer an exact divisor (no ragged masking)
            return c2
        c2 -= _LANES
    return cand                          # ragged last block handled by in-kernel mask


def channel_attention(x, fc1_weight, fc2_weight, *, block_budget_bytes=8 << 20):
    """x: (N, C, H, W); fc1_weight: (C//16, C, 1, 1); fc2_weight: (C, C//16, 1, 1).

    Returns sigmoid(fc2(relu(fc1(avgpool(x)))) + fc2(relu(fc1(maxpool(x)))))
    with shape (N, C, 1, 1), matching the PyTorch module."""
    N, C, H, W = x.shape
    HW = H * W
    Cr = fc1_weight.shape[0]

    x_flat = x.reshape(N, C, HW)                              # lane axis = H*W
    # 1x1 convs == matrices; pre-orient so in-kernel dots are plain (M,K)x(K,N).
    w1 = fc1_weight.reshape(Cr, C).T.astype(jnp.float32)      # (C, Cr)
    w2 = fc2_weight.reshape(C, Cr).T.astype(jnp.float32)      # (Cr, C)

    nb = _pick_batch_tile(N, C)
    itemsize = jnp.dtype(x.dtype).itemsize
    hw_chunk = _pick_hw_chunk(HW, nb, C, itemsize, block_budget_bytes)

    direct = (hw_chunk % _LANES) != 0           # small full-extent, lane-unaligned
    ragged = (not direct) and (HW % hw_chunk != 0)

    grid = (pl.cdiv(N, nb), pl.cdiv(HW, hw_chunk))

    kernel = functools.partial(
        _ca_kernel, inv_hw=1.0 / float(HW), hw_total=HW, hw_chunk=hw_chunk,
        ragged=ragged, direct=direct)

    out3d = pl.pallas_call(
        kernel,
        out_shape=jax.ShapeDtypeStruct((N, 1, C), x.dtype),
        grid=grid,
        in_specs=[
            pl.BlockSpec((nb, C, hw_chunk), lambda n, h: (n, 0, h)),
            pl.BlockSpec((C, Cr), lambda n, h: (0, 0)),
            pl.BlockSpec((Cr, C), lambda n, h: (0, 0)),
        ],
        out_specs=pl.BlockSpec((nb, 1, C), lambda n, h: (n, 0, 0)),
        scratch_shapes=[
            pltpu.VMEM((nb, C, _LANES), jnp.float32),   # per-lane running sums
            pltpu.VMEM((nb, C, _LANES), jnp.float32),   # per-lane running maxes
        ],
        compiler_params=pltpu.CompilerParams(
            dimension_semantics=("parallel", "arbitrary"),
            vmem_limit_bytes=48 << 20),
    )(x_flat, w1, w2)

    return out3d.reshape(N, C, 1, 1)


def _reference(x, fc1_weight, fc2_weight):
    # Pure-JAX reference mirroring the PyTorch forward.
    avg = jnp.mean(x, axis=(2, 3), keepdims=True)             # (N, C, 1, 1)
    mx = jnp.max(x, axis=(2, 3), keepdims=True)               # (N, C, 1, 1)

    def mlp(v):
        h = lax.conv_general_dilated(
            v, fc1_weight, window_strides=(1, 1), padding="VALID",
            dimension_numbers=("NCHW", "OIHW", "NCHW"))
        h = jnp.maximum(h, 0.0)
        return lax.conv_general_dilated(
            h, fc2_weight, window_strides=(1, 1), padding="VALID",
            dimension_numbers=("NCHW", "OIHW", "NCHW"))

    return jax.nn.sigmoid(mlp(avg) + mlp(mx))


if __name__ == "__main__":
    root = jax.random.PRNGKey(0)

    def check(n, c, h, w, budget_bytes):
        kx, k1, k2 = jax.random.split(jax.random.fold_in(root, n * 1000 + h), 3)
        cr = c // 16
        x = jax.random.normal(kx, (n, c, h, w), dtype=jnp.float32)
        fc1 = jax.random.normal(k1, (cr, c, 1, 1), dtype=jnp.float32) * 0.1
        fc2 = jax.random.normal(k2, (c, cr, 1, 1), dtype=jnp.float32) * 0.1
        out = jax.block_until_ready(
            channel_attention(x, fc1, fc2, block_budget_bytes=budget_bytes))
        ref = jax.block_until_ready(_reference(x, fc1, fc2))
        assert out.shape == (n, c, 1, 1)
        assert jnp.allclose(out, ref, atol=2e-5, rtol=2e-5), (
            f"mismatch for shape {(n, c, h, w)}")

    # in_planes must be >= 16 because the module hard-codes in_planes // 16.
    # Primary case (module-consistent small shapes): single even spatial chunk.
    check(2, 32, 16, 16, 8 << 20)
    # Multi-step spatial reduction with even chunking (forced via a tiny budget).
    check(2, 32, 32, 32, 64 << 10)
    # Ragged last spatial block: exercises the in-kernel mask path.
    check(2, 32, 20, 20, 32 << 10)
    # Small, lane-unaligned spatial extent: single-block direct path.
    check(2, 32, 5, 5, 8 << 20)

    print("KERNEL_OK")
</pallas_src>

<mosaic_0001>
module attributes {stable_mosaic.version = 11 : i64} {
  func.func @_ca_kernel(%arg0: i32, %arg1: i32, %arg2: memref<1x32x256xf32, #tpu.memory_space<vmem>>, %arg3: memref<32x2xf32, #tpu.memory_space<vmem>>, %arg4: memref<2x32xf32, #tpu.memory_space<vmem>>, %arg5: memref<1x1x32xf32, #tpu.memory_space<vmem>>, %arg6: memref<1x32x128xf32, #tpu.memory_space<vmem>>, %arg7: memref<1x32x128xf32, #tpu.memory_space<vmem>>) attributes {dimension_semantics = [#tpu.dimension_semantics<parallel>, #tpu.dimension_semantics<arbitrary>], iteration_bounds = array<i64: 2, 1>, scalar_prefetch = 0 : i64, scratch_operands = 2 : i64, tpu.core_type = #tpu.core_type<tc>, window_params = [{transform_indices = @transform_0, window_bounds = array<i64: 1, 32, 256>}, {pipeline_mode = #tpu.pipeline_mode<synchronous>, transform_indices = @transform_1, window_bounds = array<i64: 32, 2>}, {pipeline_mode = #tpu.pipeline_mode<synchronous>, transform_indices = @transform_2, window_bounds = array<i64: 2, 32>}, {transform_indices = @transform_3, window_bounds = array<i64: 1, 1, 32>}]} {
    %c0_i32 = arith.constant 0 : i32
    %0 = arith.cmpi eq, %arg1, %c0_i32 : i32
    %1 = arith.extui %0 : i1 to i32
    %c0_i32_0 = arith.constant 0 : i32
    %2 = arith.cmpi ne, %1, %c0_i32_0 : i32
    scf.if %2 {
      %cst = arith.constant 0.000000e+00 : f32
      %16 = vector.broadcast %cst : f32 to vector<1x32x128xf32>
      %c0_19 = arith.constant 0 : index
      %c0_20 = arith.constant 0 : index
      %c0_21 = arith.constant 0 : index
      %17 = vector.load %arg6[%c0_19, %c0_20, %c0_21] : memref<1x32x128xf32, #tpu.memory_space<vmem>>, vector<1x32x128xf32>
      tpu.vector_store %arg6[%c0_19, %c0_20, %c0_21], %16 {strides = array<i32>} : memref<1x32x128xf32, #tpu.memory_space<vmem>>, vector<1x32x128xf32>,
      %cst_22 = arith.constant 0xFF800000 : f32
      %18 = vector.broadcast %cst_22 : f32 to vector<1x32x128xf32>
      %c0_23 = arith.constant 0 : index
      %c0_24 = arith.constant 0 : index
      %c0_25 = arith.constant 0 : index
      %19 = vector.load %arg7[%c0_23, %c0_24, %c0_25] : memref<1x32x128xf32, #tpu.memory_space<vmem>>, vector<1x32x128xf32>
      tpu.vector_store %arg7[%c0_23, %c0_24, %c0_25], %18 {strides = array<i32>} : memref<1x32x128xf32, #tpu.memory_space<vmem>>, vector<1x32x128xf32>,
    } else {
    }
    %c0 = arith.constant 0 : index
    %c0_1 = arith.constant 0 : index
    %c0_2 = arith.constant 0 : index
    %3 = vector.load %arg6[%c0, %c0_1, %c0_2] : memref<1x32x128xf32, #tpu.memory_space<vmem>>, vector<1x32x128xf32>
    %c0_3 = arith.constant 0 : index
    %c0_4 = arith.constant 0 : index
    %c0_5 = arith.constant 0 : index
    %4 = vector.load %arg7[%c0_3, %c0_4, %c0_5] : memref<1x32x128xf32, #tpu.memory_space<vmem>>, vector<1x32x128xf32>
    %c0_6 = arith.constant 0 : index
    %c0_7 = arith.constant 0 : index
    %c0_8 = arith.constant 0 : index
    %5 = vector.load %arg2[%c0_6, %c0_7, %c0_8] : memref<1x32x256xf32, #tpu.memory_space<vmem>>, vector<1x32x128xf32>
    %6 = arith.addf %3, %5 : vector<1x32x128xf32>
    %7 = arith.maximumf %4, %5 : vector<1x32x128xf32>
    %c0_9 = arith.constant 0 : index
    %c0_10 = arith.constant 0 : index
    %c128 = arith.constant 128 : index
    %8 = vector.load %arg2[%c0_9, %c0_10, %c128] : memref<1x32x256xf32, #tpu.memory_space<vmem>>, vector<1x32x128xf32>
    %9 = arith.addf %6, %8 : vector<1x32x128xf32>
    %10 = arith.maximumf %7, %8 : vector<1x32x128xf32>
    %c0_11 = arith.constant 0 : index
    %c0_12 = arith.constant 0 : index
    %c0_13 = arith.constant 0 : index
    %11 = vector.load %arg6[%c0_11, %c0_12, %c0_13] : memref<1x32x128xf32, #tpu.memory_space<vmem>>, vector<1x32x128xf32>
    tpu.vector_store %arg6[%c0_11, %c0_12, %c0_13], %9 {strides = array<i32>} : memref<1x32x128xf32, #tpu.memory_space<vmem>>, vector<1x32x128xf32>,
    %c0_14 = arith.constant 0 : index
    %c0_15 = arith.constant 0 : index
    %c0_16 = arith.constant 0 : index
    %12 = vector.load %arg7[%c0_14, %c0_15, %c0_16] : memref<1x32x128xf32, #tpu.memory_space<vmem>>, vector<1x32x128xf32>
    tpu.vector_store %arg7[%c0_14, %c0_15, %c0_16], %10 {strides = array<i32>} : memref<1x32x128xf32, #tpu.memory_space<vmem>>, vector<1x32x128xf32>,
    %c0_i32_17 = arith.constant 0 : i32
    %13 = arith.cmpi eq, %arg1, %c0_i32_17 : i32
    %14 = arith.extui %13 : i1 to i32
    %c0_i32_18 = arith.constant 0 : i32
    %15 = arith.cmpi ne, %14, %c0_i32_18 : i32
    scf.if %15 {
      %c0_19 = arith.constant 0 : index
      %c0_20 = arith.constant 0 : index
      %c0_21 = arith.constant 0 : index
      %16 = vector.load %arg6[%c0_19, %c0_20, %c0_21] : memref<1x32x128xf32, #tpu.memory_space<vmem>>, vector<1x32x128xf32>
      %cst = arith.constant dense<0.000000e+00> : vector<1x32xf32>
      %17 = vector.multi_reduction <add>, %16, %cst [2] : vector<1x32x128xf32> to vector<1x32xf32>
      %cst_22 = arith.constant 3.906250e-03 : f32
      %18 = vector.broadcast %cst_22 : f32 to vector<1x32xf32>
      %19 = arith.mulf %17, %18 : vector<1x32xf32>
      %c0_23 = arith.constant 0 : index
      %c0_24 = arith.constant 0 : index
      %c0_25 = arith.constant 0 : index
      %20 = vector.load %arg7[%c0_23, %c0_24, %c0_25] : memref<1x32x128xf32, #tpu.memory_space<vmem>>, vector<1x32x128xf32>
      %cst_26 = arith.constant dense<0xFF800000> : vector<1x32xf32>
      %21 = vector.multi_reduction <maximumf>, %20, %cst_26 [2] : vector<1x32x128xf32> to vector<1x32xf32>
      %c0_27 = arith.constant 0 : index
      %c0_28 = arith.constant 0 : index
      %22 = vector.load %arg3[%c0_27, %c0_28] : memref<32x2xf32, #tpu.memory_space<vmem>>, vector<32x2xf32>
      %c0_29 = arith.constant 0 : index
      %c0_30 = arith.constant 0 : index
      %23 = vector.load %arg4[%c0_29, %c0_30] : memref<2x32xf32, #tpu.memory_space<vmem>>, vector<2x32xf32>
      %cst_31 = arith.constant dense<0.000000e+00> : vector<1x2xf32>
      %24 = tpu.matmul %19, %22, %cst_31 {dimension_numbers = #tpu.dot_dimension_numbers<[1], [0], [0], [1], [0, 0, 1, 1], [], []>} : vector<1x32xf32>, vector<32x2xf32>, vector<1x2xf32> -> vector<1x2xf32>
      %cst_32 = arith.constant 0.000000e+00 : f32
      %25 = vector.broadcast %cst_32 : f32 to vector<1x2xf32>
      %26 = arith.maximumf %24, %25 : vector<1x2xf32>
      %cst_33 = arith.constant dense<0.000000e+00> : vector<1x2xf32>
      %27 = tpu.matmul %21, %22, %cst_33 {dimension_numbers = #tpu.dot_dimension_numbers<[1], [0], [0], [1], [0, 0, 1, 1], [], []>} : vector<1x32xf32>, vector<32x2xf32>, vector<1x2xf32> -> vector<1x2xf32>
      %cst_34 = arith.constant 0.000000e+00 : f32
      %28 = vector.broadcast %cst_34 : f32 to vector<1x2xf32>
      %29 = arith.maximumf %27, %28 : vector<1x2xf32>
      %cst_35 = arith.constant dense<0.000000e+00> : vector<1x32xf32>
      %30 = tpu.matmul %26, %23, %cst_35 {dimension_numbers = #tpu.dot_dimension_numbers<[1], [0], [0], [1], [0, 0, 1, 1], [], []>} : vector<1x2xf32>, vector<2x32xf32>, vector<1x32xf32> -> vector<1x32xf32>
      %cst_36 = arith.constant dense<0.000000e+00> : vector<1x32xf32>
      %31 = tpu.matmul %29, %23, %cst_36 {dimension_numbers = #tpu.dot_dimension_numbers<[1], [0], [0], [1], [0, 0, 1, 1], [], []>} : vector<1x2xf32>, vector<2x32xf32>, vector<1x32xf32> -> vector<1x32xf32>
      %32 = arith.addf %30, %31 : vector<1x32xf32>
      %33 = arith.negf %32 : vector<1x32xf32>
      %34 = math.exp %33 : vector<1x32xf32>
      %cst_37 = arith.constant 1.000000e+00 : f32
      %35 = vector.broadcast %cst_37 : f32 to vector<1x32xf32>
      %36 = arith.addf %35, %34 : vector<1x32xf32>
      %37 = arith.divf %35, %36 : vector<1x32xf32>
      %38 = vector.shape_cast %37 : vector<1x32xf32> to vector<32xf32>
      %c0_38 = arith.constant 0 : index
      %c0_39 = arith.constant 0 : index
      %c0_40 = arith.constant 0 : index
      %39 = vector.load %arg5[%c0_38, %c0_39, %c0_40] : memref<1x1x32xf32, #tpu.memory_space<vmem>>, vector<1x1x32xf32>
      %40 = vector.shape_cast %39 : vector<1x1x32xf32> to vector<32xf32>
      %41 = vector.shape_cast %38 : vector<32xf32> to vector<1x1x32xf32>
      tpu.vector_store %arg5[%c0_38, %c0_39, %c0_40], %41 {strides = array<i32>} : memref<1x1x32xf32, #tpu.memory_space<vmem>>, vector<1x1x32xf32>,
    } else {
    }
    return
  }
  func.func @transform_0(%arg0: i32, %arg1: i32) -> (i32, i32, i32) {
    %c0_i32 = arith.constant 0 : i32
    %c0_i32_0 = arith.constant 0 : i32
    return %arg0, %c0_i32, %arg1 : i32, i32, i32
  }
  func.func @transform_1(%arg0: i32, %arg1: i32) -> (i32, i32) {
    %c0_i32 = arith.constant 0 : i32
    %c0_i32_0 = arith.constant 0 : i32
    %c0_i32_1 = arith.constant 0 : i32
    return %c0_i32, %c0_i32_0 : i32, i32
  }
  func.func @transform_2(%arg0: i32, %arg1: i32) -> (i32, i32) {
    %c0_i32 = arith.constant 0 : i32
    %c0_i32_0 = arith.constant 0 : i32
    %c0_i32_1 = arith.constant 0 : i32
    return %c0_i32, %c0_i32_0 : i32, i32
  }
  func.func @transform_3(%arg0: i32, %arg1: i32) -> (i32, i32, i32) {
    %c0_i32 = arith.constant 0 : i32
    %c0_i32_0 = arith.constant 0 : i32
    %c0_i32_1 = arith.constant 0 : i32
    return %arg0, %c0_i32, %c0_i32_0 : i32, i32, i32
  }
}

</mosaic_0001>

<bundles_post_ra>
// kernel: tpu_custom_call.1
= control target key start
LH: loop header
LB: loop body
LE: loop exit
PB: predicated region body
PF: predicated region fallthrough
CT: control target
= control target key end

     0   :  { %8 = vsyncpa [#allocation5], 0  ;;  %s895_s0 = inlined_call_operand.hbm [shape: f32[2,32,256], index: 0, kind: input, shape index: {}]   ;;  %s896_s1 = inlined_call_operand.vmem [shape: f32[32,2], index: 1, kind: input, shape index: {}]   ;;  %s897_s2 = inlined_call_operand.vmem [shape: f32[2,32], index: 2, kind: input, shape index: {}]   ;;  %s898_s3 = inlined_call_operand.hbm [shape: f32[2,1,32], index: 3, kind: output, shape index: {}]  }
   0x1   :  { %10 = vsyncpa [#allocation5 + $0x1], 0 }
   0x2   :  { %11 = vsyncpa [#allocation6], 0 }
   0x3   :  { %13 = vsyncpa [#allocation6 + $0x1], 0  ;;  %s757_s12 = smov 0   ;;  %s759_s13 = smov 0  }
   0x4   :  { %s761_s14 = smov 0   ;;  %s763_s15 = smov 0  }
   0x5   :  { %s765_s16 = smov 0   ;;  %s767_s17 = smov 0  }
   0x6 LB: > { %s534_s18 = sadd.s32 4294967295, %s733_s17   ;;  %s535_s19 = sadd.s32 4294967294, %s733_s17   ;;  %s733_s17 = sphi %s767_s17, %s19_s17   ;;  %s729_s16 = sphi %s765_s16, %s907_s16   ;;  %s725_s15 = sphi %s763_s15, %s906_s15   ;;  %s721_s14 = sphi %s761_s14, %s905_s14   ;;  %s717_s13 = sphi %s759_s13, %s904_s13   ;;  %s713_s12 = sphi %s757_s12, %s903_s12  }
   0x7   : > { %s31_s20 = sadd.s32 1, %s729_s16  ;;  %s40_s21 = sadd.s32 1, %s721_s14 }
   0x8   : > { %p33_p0 = scmp.ge.s32.totalorder %s31_s20, 2  ;;  %p47_p1 = scmp.ne.s32.totalorder %s721_s14, %s717_s13 }
   0x9   : > { %p48_p2 = scmp.eq.s32.totalorder %s733_s17, 0  ;;  %p53_p3 = scmp.ne.s32.totalorder %s717_s13, %s713_s12 }
   0xa   : > { %s909_s20 = smov (%p33_p0, %s31_s20), 0  ;;  %p54_p5 = scmp.eq.s32.totalorder %s534_s18, 0 }
   0xb   : > { %p798_p4 = por %p48_p2, %p47_p1  ;;  %s35_s23 = ssub.s32 %s729_s16, %s909_s20 }
   0xc   : > { %p119_p6 = scmp.eq.s32.totalorder %s534_s18, 1  ;;  %p38_p7 = scmp.eq.s32.totalorder %s35_s23, 0 }
   0xd   : > { %p804_p8 = por %p54_p5, %p53_p3  ;;  %p125_p10 = scmp.eq.s32.totalorder %s535_s19, 1 }
   0xe   : > { %p808_p9 = por %p119_p6, %p47_p1  ;;  %p537_p12 = scmp.ge.s32.totalorder %s733_s17, 2 }
   0xf   : > { %s813_s26 = scalar_select %p38_p7, %s721_s14, %s40_s21  }
  0x10   : > { %p815_p11 = por %p125_p10, %p53_p3  ;;  %p565_p13 = scmp.lt.s32.totalorder %s733_s17, 2 }
  0x11   : > { %s151_s28 = sand.u32 1, %s721_s14   ;;  %s552_s30 = sshll.u32 %s729_s16, 6 }
  0x12   : > { %s538_s29 = sshll.u32 %s151_s28, 6  ;;  %s162_s6 = scalar_lea.hbm %s895_s0, %s552_s30 }
  0x13   : > { %s155_s7 = scalar_lea.vmem [#allocation4], %s538_s29  ;;  %s163_s9 = sshll.u32 %s162_s6, 4  ;;  %s164_s9 = int_to_ptr.hbm [resolvable:$true] %s163_s9 }
  0x14   : > { %s165_s8 = sshll.u32 %s155_s7, 4  ;;  %p558_p0 = pnand %p565_p13, %p798_p4  ;;  %s166_s8 = int_to_ptr.vmem [resolvable:$true] %s165_s8 }
  0x15   : > { %p541_p1 = scmp.ge.s32.totalorder %s733_s17, 1  ;;  %s152_s10 = scalar_lea.sflag [#allocation5], %s151_s28 }
  0x16   : > { %s735_s11 = smov 256   ;;  %s736_s18 = smov 16  }
  0x17   : > { %560 = dma.hbm_to_vmem [thread:$0]  (!%p558_p0), %s164_s9, 1024, %s166_s8, %s152_s10, %s735_s11, %s735_s11, %s736_s18  }
  0x18   : > { %p173_p2 = scmp.lt.s32.totalorder %s733_s17, 3 }
  0x1a   : > { %p174_p3 = pnand %p541_p1, %p173_p2 }
  0x1b   : > { %s831_s19 = sand.u32 (!%p174_p3), 1, %s717_s13  }
  0x1c   : > { %177 = sbr.rel (%p174_p3) target bundleno = 466 (0x1d2), region = 32  ;;  %s542_s21 = sshll.u32 (!%p174_p3), %s831_s19, 6 }
  0x1d   : > { %s180_s23 = scalar_lea.sflag (!%p174_p3), [#allocation5], %s831_s19  ;;  %s183_s29 = scalar_lea.vmem (!%p174_p3), [#allocation4], %s542_s21 }
  0x21   : > { %704 = dma.done.wait (%p804_p8), %s180_s23, 1024  }
  0x22   : > { %706 = vsyncadd (%p804_p8), %s180_s23, 4294966272  ;;  %v227_v0 = vld [vmem:[%s183_s29] sm:$0xff]  ;;  %v239_v1 = vld [vmem:[%s183_s29 + $0x8] sm:$0xff]  ;;  %v299_v20 = vlaneseq  ;;  %vm308_vm0 = vcmask 195712   ;;  %vm304_vm1 = vcmask 130112   ;;  %vm312_vm2 = vcmask 261312   ;;  %s453_s18 = scalar_lea.hbm %s898_s3, %s725_s15 }
  0x23   : > { %v229_v2 = vld [vmem:[%s183_s29 + $0x20] sm:$0xff]  ;;  %v247_v3 = vmax.f32 %v227_v0, %v239_v1  ;;  %v243_v4 = vadd.f32 %v239_v1, %v227_v0  ;;  %v241_v5 = vld [vmem:[%s183_s29 + $0x28] sm:$0xff]  ;;  %v228_v7 = vld [vmem:[%s183_s29 + $0x10] sm:$0xff]  ;;  %vm314_vm3 = vcmask 261120   ;;  %vm376_vm4 = vcmask 1041408   ;;  %s205_s21 = scalar_lea.vmem [#allocation7], %s831_s19 }
  0x24   : > { %v245_v6 = vadd.f32 %v241_v5, %v229_v2  ;;  %v240_v8 = vld [vmem:[%s183_s29 + $0x18] sm:$0xff]  ;;  %v230_v9 = vld [vmem:[%s183_s29 + $0x30] sm:$0xff]  ;;  %v249_v14 = vmax.f32 %v229_v2, %v241_v5  ;;  %v291_v18 = vld [vmem:[%s896_s1 + $0x8] sm:$0xff]  ;;  %v300_v24 = vand.u32 127, %v299_v20  ;;  %vm372_vm5 = vcmask 15360   ;;  %s455_s23 = sshll.u32 %s205_s21, 4  ;;  %s456_s23 = int_to_ptr.vmem [resolvable:$true] %s455_s23 }
  0x25   : > { %282 = vmax.xlane.f32.xlu2 %v247_v3  ;;  %266 = vadd.xlane.f32.xlu0 %v243_v4  ;;  %v242_v10 = vld [vmem:[%s183_s29 + $0x38] sm:$0xff]  ;;  %v248_v11 = vmax.f32 %v228_v7, %v240_v8  ;;  %v244_v12 = vadd.f32 %v240_v8, %v228_v7  ;;  %v292_v17 = vld [vmem:[%s896_s1 + $0x10] sm:$0xff]  ;;  %v290_v19 = vld [vmem:[%s896_s1] sm:$0xff]  ;;  %s457_s29 = sshll.u32 %s453_s18, 4  ;;  %vm442_vm9 = vcmask 253952   ;;  %s445_s15 = scalar_lea.sflag [#allocation6], %s831_s19  ;;  %s458_s29 = int_to_ptr.hbm [resolvable:$true] %s457_s29 }
  0x26   : > { %270 = vadd.xlane.f32.xlu1 %v245_v6  ;;  %v246_v13 = vadd.f32 %v242_v10, %v230_v9  ;;  %v250_v15 = vmax.f32 %v230_v9, %v242_v10  ;;  %v293_v16 = vld [vmem:[%s896_s1 + $0x18] sm:$0xff]  ;;  %v306_v26 = vadd.s32 4294967280, %v300_v24  ;;  %v310_v29 = vadd.s32 4294967272, %v300_v24  ;;  %v294_v51 = vld [vmem:[%s897_s2] sm:$0x3]  ;;  %s665_s22 = sshra.s32 %s458_s29, 4  ;;  %s666_s22 = int_to_ptr.hbm [resolvable:$true] %s665_s22 }
  0x27   : > { %329 = vmatpush.msra.mxu0 %v293_v16  ;;  %363 = vmatpush.msra.mxu1 %v293_v16  ;;  %v302_v30 = vadd.s32 4294967288, %v300_v24  ;;  %s667_s24 = scalar_lea.hbm %s666_s22, 1  ;;  %s671_s4 = scalar_lea.hbm %s898_s3, 2 }
  0x28   : > { %547 = vmatpush.msk.msra.mxu3 %vm376_vm4, %v294_v51  ;;  %545 = vmatpush.msk.msra.mxu2 %vm376_vm4, %v294_v51  ;;  %p668_p4 = scmp.ne.s32.totalorder %s666_s22, %s667_s24  ;;  %p672_p7 = scmp.lt.s32.totalorder %s666_s22, %s898_s3 }
  0x29   : > { %330 = vmatpush.msra.mxu0 %v292_v17  ;;  %364 = vmatpush.msra.mxu1 %v292_v17  ;;  %p673_p8 = scmp.lt.s32.totalorder %s671_s4, %s667_s24 }
  0x2a   : > { %p669_p5 = pnand %p668_p4, %p808_p9 }
  0x2b   : > { %331 = vmatpush.msra.mxu0 %v291_v18  ;;  %365 = vmatpush.msra.mxu1 %v291_v18  ;;  %p674_p10 = por %p673_p8, %p672_p7 }
  0x2c   : > { %p670_p6 = pneg %p669_p5 }
  0x2d   : > { %284 = vmax.xlane.f32.xlu2 %v248_v11  ;;  %268 = vadd.xlane.f32.xlu0 %v244_v12 }
  0x2e   : > { %272 = vadd.xlane.f32.xlu1 %v246_v13  ;;  %332 = vmatpush.msra.mxu0 %v290_v19  ;;  %p675_p13 = pnand %p674_p10, %p670_p6 }
  0x2f   : > { %366 = vmatpush.msra.mxu1 %v290_v19 }
  0x35   : > { %286 = vmax.xlane.f32.xlu0 %v249_v14 }
  0x36   : > { %288 = vmax.xlane.f32.xlu1 %v250_v15 }
  0x98   : > { %v267_v21 = vpop.xlane.xlu0 %266  ;;  %v283_v22 = vpop.xlane.xlu2 %282 }
  0x99   : > { %v271_v23 = vpop.xlane.xlu1 %270  ;;  %v274_v25 = vmul.f32 0.00390625, %v267_v21  ;;  %v342_v40 = vperm.slane %v283_v22, %v300_v24 }
  0x9a   : > { %v276_v27 = vmul.f32 0.00390625, %v271_v23 }
  0x9b   : > { %v301_v34 = vperm.slane %v274_v25, %v300_v24 }
  0x9c   : > { %v307_v37 = vperm.slane %v276_v27, %v306_v26 }
  0xa0   : > { %v269_v28 = vpop.xlane.xlu0 %268  ;;  %v285_v35 = vpop.xlane.xlu2 %284 }
  0xa1   : > { %v275_v31 = vmul.f32 0.00390625, %v269_v28  ;;  %v273_v32 = vpop.xlane.xlu1 %272  ;;  %v343_v41 = vperm.slane %v285_v35, %v302_v30 }
  0xa2   : > { %v277_v33 = vmul.f32 0.00390625, %v273_v32 }
  0xa3   : > { %v303_v36 = vperm.slane %v275_v31, %v302_v30  ;;  %v344_v47 = vsel %vm304_vm1, %v343_v41, %v342_v40 }
  0xa4   : > { %v311_v38 = vperm.slane %v277_v33, %v310_v29 }
  0xa5   : > { %v305_v39 = vsel %vm304_vm1, %v303_v36, %v301_v34 }
  0xa6   : > { %v309_v42 = vsel %vm308_vm0, %v307_v37, %v305_v39 }
  0xa7   : > { %v313_v43 = vsel %vm312_vm2, %v311_v38, %v309_v42 }
  0xa8   : > { %543 = vmatmul.msk.f32.vlgmr.msra.gmra.mxu0 %vm314_vm3, %v313_v43  ;;  %v287_v44 = vpop.xlane.xlu0 %286 }
  0xa9   : > { %v345_v45 = vperm.slane %v287_v44, %v306_v26  ;;  %v289_v46 = vpop.xlane.xlu1 %288 }
  0xaa   : > { %v347_v48 = vperm.slane %v289_v46, %v310_v29 }
  0xab   : > { %v346_v49 = vsel %vm308_vm0, %v345_v45, %v344_v47 }
  0xac   : > { %v348_v50 = vsel %vm312_vm2, %v347_v48, %v346_v49 }
  0xad   : > { %544 = vmatmul.msk.f32.vlgmr.msra.gmra.mxu1 %vm314_vm3, %v348_v50 }
 0x125   : > { %v334_v52 = vpop.f32.mrf.mxu0 }
 0x126   : > { %v337_v53 = vmax.f32 %v334_v52, 0.0 }
 0x128   : > { %548 = vmatmul.msk.f32.vlgmr.msra.gmra.mxu3 %vm372_vm5, %v337_v53 }
 0x12a   : > { %v368_v54 = vpop.f32.mrf.mxu1 }
 0x12b   : > { %v371_v55 = vmax.f32 %v368_v54, 0.0 }
 0x12d   : > { %546 = vmatmul.msk.f32.vlgmr.msra.gmra.mxu2 %vm372_vm5, %v371_v55 }
 0x1ab   : > { %v420_v56 = vpop.f32.mrf.mxu3 }
 0x1b0   : > { %v397_v57 = vpop.f32.mrf.mxu2 }
 0x1b1   : > { %v421_v58 = vadd.f32 %v420_v56, %v397_v57 }
 0x1b3   : > { %v549_v59 = vmul.f32 -1.442695, %v421_v58 }
 0x1b5   : > { %617 = vpow2.f32 %v549_v59 }
 0x1bb   : > { %v618_v60 = vpop.eup %617 }
 0x1bc   : > { %v426_v61 = vadd.f32 1.0, %v618_v60 }
 0x1be   : > { %619 = vrcp.f32 %v426_v61  ;;  %v438_v1 = vand.u32 2147483648, %v426_v61  ;;  %v436_v3 = vand.u32 2147483647, %v426_v61  ;;  %vm432_vm7 = vweird.f32 %v426_v61 }
 0x1c0   : > { %v439_v5 = vor.u32 1.1754944e-38, %v438_v1  ;;  %vm437_vm10 = vcmp.eq.f32.partialorder %v436_v3, 8.507059e+37 }
 0x1c4   : > { %v620_v62 = vpop.eup %619 }
 0x1c5   : > { %v428_v63 = vmul.f32 %v620_v62, %v426_v61  ;;  %vm433_vm6 = vweird.f32 %v620_v62 }
 0x1c6   : > { %vm434_vm8 = vmor %vm432_vm7, %vm433_vm6 }
 0x1c7   : > { %v429_v0 = vsub.f32 1.0, %v428_v63 }
 0x1c9   : > { %v430_v2 = vmul.f32 %v620_v62, %v429_v0 }
 0x1cb   : > { %v431_v4 = vadd.f32 %v620_v62, %v430_v2 }
 0x1cd   : > { %v435_v6 = vsel %vm434_vm8, %v620_v62, %v431_v4 }
 0x1ce   : > { %v440_v7 = vsel %vm437_vm10, %v439_v5, %v435_v6 }
 0x1cf   : > { %443 = vst.msk [vmem:[%s205_s21] sm:$0x1] %vm442_vm9, %v440_v7 }
 0x1d0   : > { %678 = shalt.err (!%p675_p13)
}
 0x1d1   : > { %555 = dma.vmem_to_hbm [thread:$0]  (%p808_p9), %s456_s23, 16, %s458_s29, %s445_s15  }
 0x1d2 PF: > { %s469_s19 = sand.u32 1, %s713_s12   ;;  %p562_p0 = pnand %p537_p12, %p815_p11 }
 0x1d3   : > { %s470_s7 = scalar_lea.sflag [#allocation6], %s469_s19 }
 0x1d4   : > { %p563_p1 = pneg %p562_p0 }
 0x1d6   : > { %708 = dma.done.wait (%p563_p1), %s470_s7, 16  }
 0x1d7   : > { %710 = vsyncadd (%p563_p1), %s470_s7, 4294967280  ;;  %s19_s17 = sadd.s32 1, %s733_s17   ;;  %s903_s12 = smov %s717_s13 }
 0x1d8   : > { %p16_p2 = scmp.ge.s32.totalorder %s19_s17, 4   ;;  %s904_s13 = smov %s721_s14 }
 0x1d9   : > { %s905_s14 = smov %s813_s26  ;;  %s906_s15 = smov %s729_s16 }
 0x1da   : > { %s907_s16 = smov %s909_s20  ;;  %18 = sbr.rel (!%p16_p2) target bundleno = 6 (0x6), region = 85 }
 0x1df   :  { %475 = vsyncpa [#allocation5], 1 }
 0x1e0   :  { %477 = vsyncpa [#allocation5 + $0x1], 1 }
 0x1e1   :  { %478 = vsyncpa [#allocation6], 1 }
 0x1e2   :  { %480 = vsyncpa [#allocation6 + $0x1], 1 }

</bundles_post_ra>
